<compile_context>
chip_gen: v7x
topology: tpu7x:2x2x1
jax: 0.10.0
libtpu: 0.0.40
codegen_flags: <defaults>
</compile_context>

<pallas_src>
import functools

import jax
import jax.numpy as jnp
from jax.experimental import pallas as pl
from jax.experimental.pallas import tpu as pltpu

LANE = 128
MAX_BLOCK_ROWS = 8192          # (8192, 128) f32 block = 4 MiB per input
VMEM_LIMIT_BYTES = 32 * 1024 * 1024


def _num_tensorcores_per_chip():
    """2 only on v7x (2 TCs/chip); 1 on single-core v5e/v6e (and on failure)."""
    try:
        kind = jax.devices()[0].device_kind.lower()
    except Exception:
        return 1
    return 2 if "7" in kind else 1


def _sublane_multiple(dtype):
    # f32 -> 8, bf16 -> 16, int8/bool -> 32 (packed min-tile second-minor).
    itemsize = max(1, jnp.dtype(dtype).itemsize)
    return max(8, 32 // itemsize)


def _dice_sums_kernel(x_ref, t_ref, acc_ref, *, block_rows, total_rows,
                      blocks_per_split, needs_mask):
    """acc[0] += rowsum(sig(x)*t); acc[1] += rowsum(sig(x)); acc[2] += rowsum(t)."""
    c = pl.program_id(0)
    i = pl.program_id(1)

    @pl.when(i == 0)
    def _():
        acc_ref[...] = jnp.zeros_like(acc_ref)

    x = x_ref[...].astype(jnp.float32)      # (block_rows, LANE)
    t = t_ref[...].astype(jnp.float32)
    s = jax.nn.sigmoid(x)

    def accumulate(sv, tv):
        # Lane-wise partial sums only (plain VPU vreg adds); the single
        # cross-lane reduce happens once in the wrapper.
        acc_ref[0, 0] += jnp.sum(sv * tv, axis=0, keepdims=True)
        acc_ref[0, 1] += jnp.sum(sv, axis=0, keepdims=True)
        acc_ref[0, 2] += jnp.sum(tv, axis=0, keepdims=True)

    if not needs_mask:
        # Statically known: every block is full and unique -> no mask anywhere.
        accumulate(s, t)
    else:
        base = (c * blocks_per_split + i) * block_rows
        in_bounds = base + block_rows <= total_rows

        @pl.when(in_bounds)
        def _():
            # Mask-free fast path for interior blocks.
            accumulate(s, t)

        @pl.when(jnp.logical_not(in_bounds))
        def _():
            # Boundary (partial) block or clamped duplicate of the core split:
            # sublane iota vs. scalar, broadcast along lanes.  `where`, not a
            # multiply, so garbage in the out-of-bounds region cannot propagate.
            row = jax.lax.broadcasted_iota(jnp.int32, (block_rows, 1), 0)
            valid = row < (total_rows - base)
            accumulate(jnp.where(valid, s, 0.0), jnp.where(valid, t, 0.0))


def dice_loss(inputs, targets, smooth=1e-6):
    x = inputs.reshape(-1)
    t = targets.reshape(-1)
    n = x.shape[0]

    if n == 0:  # dice == smooth / smooth == 1  ->  loss == 0
        return jnp.asarray(0.0, dtype=jnp.float32)

    rem = n % LANE
    rows = n // LANE

    # Ragged sub-128 tail: tiny wrapper-side math instead of a full-array pad.
    tail_i = tail_s = tail_t = None
    if rem:
        xt = x[n - rem:].astype(jnp.float32)
        tt = t[n - rem:].astype(jnp.float32)
        st = jax.nn.sigmoid(xt)
        tail_i = jnp.sum(st * tt)
        tail_s = jnp.sum(st)
        tail_t = jnp.sum(tt)

    if rows == 0:
        # Whole input is smaller than one lane row; nothing left for the kernel.
        dice = (2.0 * tail_i + smooth) / (tail_s + tail_t + smooth)
        return 1.0 - dice

    if rem:
        # Rare ragged case: one slice copy of the bulk (typical UNet sizes with
        # numel % 128 == 0 never hit this; the reshape below is then a bitcast).
        x = jax.lax.slice(x, (0,), (rows * LANE,))
        t = jax.lax.slice(t, (0,), (rows * LANE,))
    x2 = x.reshape(rows, LANE)
    t2 = t.reshape(rows, LANE)

    sub = max(_sublane_multiple(x2.dtype), _sublane_multiple(t2.dtype))
    block_rows = min(MAX_BLOCK_ROWS, pl.cdiv(rows, sub) * sub)
    num_blocks = pl.cdiv(rows, block_rows)

    num_splits = _num_tensorcores_per_chip() if num_blocks > 1 else 1
    blocks_per_split = pl.cdiv(num_blocks, num_splits)
    needs_mask = (num_splits * blocks_per_split * block_rows) != rows

    def in_index_map(c, i):
        # Clamp so the block DMA never starts past the last (possibly partial)
        # block; duplicated work is zeroed by the boundary-block mask.
        return (jnp.minimum(c * blocks_per_split + i, num_blocks - 1), 0)

    kernel = functools.partial(
        _dice_sums_kernel,
        block_rows=block_rows,
        total_rows=rows,
        blocks_per_split=blocks_per_split,
        needs_mask=needs_mask,
    )

    in_spec = pl.BlockSpec((block_rows, LANE), in_index_map)
    acc = pl.pallas_call(
        kernel,
        out_shape=jax.ShapeDtypeStruct((num_splits, 3, 1, LANE), jnp.float32),
        grid=(num_splits, blocks_per_split),
        in_specs=[in_spec, in_spec],
        out_specs=pl.BlockSpec((1, 3, 1, LANE), lambda c, i: (c, 0, 0, 0)),
        compiler_params=pltpu.CompilerParams(
            dimension_semantics=("parallel", "arbitrary"),
            vmem_limit_bytes=VMEM_LIMIT_BYTES),
    )(x2, t2)

    totals = jnp.sum(acc, axis=(0, 2, 3))   # [sum(sig*t), sum(sig), sum(t)]
    inter, s_sum, t_sum = totals[0], totals[1], totals[2]
    if rem:
        inter = inter + tail_i
        s_sum = s_sum + tail_s
        t_sum = t_sum + tail_t

    dice = (2.0 * inter + smooth) / (s_sum + t_sum + smooth)
    return 1.0 - dice


def _dice_loss_ref(inputs, targets, smooth=1e-6):
    x = jax.nn.sigmoid(inputs.astype(jnp.float32)).reshape(-1)
    t = targets.astype(jnp.float32).reshape(-1)
    intersection = jnp.sum(x * t)
    dice = (2.0 * intersection + smooth) / (jnp.sum(x) + jnp.sum(t) + smooth)
    return 1.0 - dice


if __name__ == "__main__":
    key = jax.random.PRNGKey(0)
    k1, k2, k3, k4 = jax.random.split(key, 4)

    # NCHW logits and binary target mask, as a UNet segmentation loss expects.
    x = jax.random.normal(k1, (2, 4, 16, 16), dtype=jnp.float32)
    tgt = (jax.random.uniform(k2, (2, 4, 16, 16)) > 0.5).astype(jnp.float32)
    loss = jax.block_until_ready(dice_loss(x, tgt))
    ref = jax.block_until_ready(_dice_loss_ref(x, tgt))
    assert jnp.allclose(loss, ref, atol=1e-5, rtol=1e-5), (loss, ref)

    # Ragged shape (numel % 128 != 0) exercises the boundary-mask + tail path.
    xr = jax.random.normal(k3, (2, 3, 13, 11), dtype=jnp.float32)
    tr = (jax.random.uniform(k4, (2, 3, 13, 11)) > 0.5).astype(jnp.float32)
    loss_r = jax.block_until_ready(dice_loss(xr, tr))
    ref_r = jax.block_until_ready(_dice_loss_ref(xr, tr))
    assert jnp.allclose(loss_r, ref_r, atol=1e-5, rtol=1e-5), (loss_r, ref_r)

    print("KERNEL_OK")
</pallas_src>

<mosaic_0001>
module attributes {stable_mosaic.version = 11 : i64} {
  func.func @_dice_sums_kernel(%arg0: i32, %arg1: i32, %arg2: memref<16x128xf32, #tpu.memory_space<vmem>>, %arg3: memref<16x128xf32, #tpu.memory_space<vmem>>, %arg4: memref<1x3x1x128xf32, #tpu.memory_space<vmem>>) attributes {dimension_semantics = [#tpu.dimension_semantics<parallel>, #tpu.dimension_semantics<arbitrary>], iteration_bounds = array<i64: 1, 1>, scalar_prefetch = 0 : i64, scratch_operands = 0 : i64, tpu.core_type = #tpu.core_type<tc>, window_params = [{transform_indices = @transform_0, window_bounds = array<i64: 16, 128>}, {transform_indices = @transform_1, window_bounds = array<i64: 16, 128>}, {transform_indices = @transform_2, window_bounds = array<i64: 1, 3, 1, 128>}]} {
    %c0_i32 = arith.constant 0 : i32
    %0 = arith.cmpi eq, %arg1, %c0_i32 : i32
    %1 = arith.extui %0 : i1 to i32
    %c0_i32_0 = arith.constant 0 : i32
    %2 = arith.cmpi ne, %1, %c0_i32_0 : i32
    scf.if %2 {
      %cst_29 = arith.constant 0.000000e+00 : f32
      %35 = vector.broadcast %cst_29 : f32 to vector<1x3x1x128xf32>
      %c0_30 = arith.constant 0 : index
      %c0_31 = arith.constant 0 : index
      %c0_32 = arith.constant 0 : index
      %c0_33 = arith.constant 0 : index
      %36 = vector.load %arg4[%c0_30, %c0_31, %c0_32, %c0_33] : memref<1x3x1x128xf32, #tpu.memory_space<vmem>>, vector<1x3x1x128xf32>
      tpu.vector_store %arg4[%c0_30, %c0_31, %c0_32, %c0_33], %35 {strides = array<i32>} : memref<1x3x1x128xf32, #tpu.memory_space<vmem>>, vector<1x3x1x128xf32>,
    } else {
    }
    %c0 = arith.constant 0 : index
    %c0_1 = arith.constant 0 : index
    %3 = vector.load %arg2[%c0, %c0_1] : memref<16x128xf32, #tpu.memory_space<vmem>>, vector<16x128xf32>
    %c0_2 = arith.constant 0 : index
    %c0_3 = arith.constant 0 : index
    %4 = vector.load %arg3[%c0_2, %c0_3] : memref<16x128xf32, #tpu.memory_space<vmem>>, vector<16x128xf32>
    %5 = arith.negf %3 : vector<16x128xf32>
    %6 = math.exp %5 : vector<16x128xf32>
    %cst = arith.constant 1.000000e+00 : f32
    %7 = vector.broadcast %cst : f32 to vector<16x128xf32>
    %8 = arith.addf %7, %6 : vector<16x128xf32>
    %9 = arith.divf %7, %8 : vector<16x128xf32>
    %c0_4 = arith.constant 0 : index
    %c0_5 = arith.constant 0 : index
    %c0_6 = arith.constant 0 : index
    %c0_7 = arith.constant 0 : index
    %10 = vector.load %arg4[%c0_4, %c0_5, %c0_6, %c0_7] : memref<1x3x1x128xf32, #tpu.memory_space<vmem>>, vector<1x1x1x128xf32>
    %11 = vector.shape_cast %10 : vector<1x1x1x128xf32> to vector<1x128xf32>
    %12 = arith.mulf %9, %4 : vector<16x128xf32>
    %cst_8 = arith.constant dense<0.000000e+00> : vector<128xf32>
    %13 = vector.multi_reduction <add>, %12, %cst_8 [0] : vector<16x128xf32> to vector<128xf32>
    %14 = vector.shape_cast %13 : vector<128xf32> to vector<1x128xf32>
    %15 = arith.addf %11, %14 : vector<1x128xf32>
    %c0_9 = arith.constant 0 : index
    %c0_10 = arith.constant 0 : index
    %c0_11 = arith.constant 0 : index
    %c0_12 = arith.constant 0 : index
    %16 = vector.load %arg4[%c0_9, %c0_10, %c0_11, %c0_12] : memref<1x3x1x128xf32, #tpu.memory_space<vmem>>, vector<1x1x1x128xf32>
    %17 = vector.shape_cast %16 : vector<1x1x1x128xf32> to vector<1x128xf32>
    %18 = vector.shape_cast %15 : vector<1x128xf32> to vector<1x1x1x128xf32>
    tpu.vector_store %arg4[%c0_9, %c0_10, %c0_11, %c0_12], %18 {strides = array<i32>} : memref<1x3x1x128xf32, #tpu.memory_space<vmem>>, vector<1x1x1x128xf32>,
    %c0_13 = arith.constant 0 : index
    %c1 = arith.constant 1 : index
    %c0_14 = arith.constant 0 : index
    %c0_15 = arith.constant 0 : index
    %19 = vector.load %arg4[%c0_13, %c1, %c0_14, %c0_15] : memref<1x3x1x128xf32, #tpu.memory_space<vmem>>, vector<1x1x1x128xf32>
    %20 = vector.shape_cast %19 : vector<1x1x1x128xf32> to vector<1x128xf32>
    %cst_16 = arith.constant dense<0.000000e+00> : vector<128xf32>
    %21 = vector.multi_reduction <add>, %9, %cst_16 [0] : vector<16x128xf32> to vector<128xf32>
    %22 = vector.shape_cast %21 : vector<128xf32> to vector<1x128xf32>
    %23 = arith.addf %20, %22 : vector<1x128xf32>
    %c0_17 = arith.constant 0 : index
    %c1_18 = arith.constant 1 : index
    %c0_19 = arith.constant 0 : index
    %c0_20 = arith.constant 0 : index
    %24 = vector.load %arg4[%c0_17, %c1_18, %c0_19, %c0_20] : memref<1x3x1x128xf32, #tpu.memory_space<vmem>>, vector<1x1x1x128xf32>
    %25 = vector.shape_cast %24 : vector<1x1x1x128xf32> to vector<1x128xf32>
    %26 = vector.shape_cast %23 : vector<1x128xf32> to vector<1x1x1x128xf32>
    tpu.vector_store %arg4[%c0_17, %c1_18, %c0_19, %c0_20], %26 {strides = array<i32>} : memref<1x3x1x128xf32, #tpu.memory_space<vmem>>, vector<1x1x1x128xf32>,
    %c0_21 = arith.constant 0 : index
    %c2 = arith.constant 2 : index
    %c0_22 = arith.constant 0 : index
    %c0_23 = arith.constant 0 : index
    %27 = vector.load %arg4[%c0_21, %c2, %c0_22, %c0_23] : memref<1x3x1x128xf32, #tpu.memory_space<vmem>>, vector<1x1x1x128xf32>
    %28 = vector.shape_cast %27 : vector<1x1x1x128xf32> to vector<1x128xf32>
    %cst_24 = arith.constant dense<0.000000e+00> : vector<128xf32>
    %29 = vector.multi_reduction <add>, %4, %cst_24 [0] : vector<16x128xf32> to vector<128xf32>
    %30 = vector.shape_cast %29 : vector<128xf32> to vector<1x128xf32>
    %31 = arith.addf %28, %30 : vector<1x128xf32>
    %c0_25 = arith.constant 0 : index
    %c2_26 = arith.constant 2 : index
    %c0_27 = arith.constant 0 : index
    %c0_28 = arith.constant 0 : index
    %32 = vector.load %arg4[%c0_25, %c2_26, %c0_27, %c0_28] : memref<1x3x1x128xf32, #tpu.memory_space<vmem>>, vector<1x1x1x128xf32>
    %33 = vector.shape_cast %32 : vector<1x1x1x128xf32> to vector<1x128xf32>
    %34 = vector.shape_cast %31 : vector<1x128xf32> to vector<1x1x1x128xf32>
    tpu.vector_store %arg4[%c0_25, %c2_26, %c0_27, %c0_28], %34 {strides = array<i32>} : memref<1x3x1x128xf32, #tpu.memory_space<vmem>>, vector<1x1x1x128xf32>,
    return
  }
  func.func @transform_0(%arg0: i32, %arg1: i32) -> (i32, i32) {
    %c1_i32 = arith.constant 1 : i32
    %0 = arith.muli %arg0, %c1_i32 : i32
    %1 = arith.addi %0, %arg1 : i32
    %c0_i32 = arith.constant 0 : i32
    %2 = arith.minsi %1, %c0_i32 : i32
    %c0_i32_0 = arith.constant 0 : i32
    %c0_i32_1 = arith.constant 0 : i32
    return %2, %c0_i32_0 : i32, i32
  }
  func.func @transform_1(%arg0: i32, %arg1: i32) -> (i32, i32) {
    %c1_i32 = arith.constant 1 : i32
    %0 = arith.muli %arg0, %c1_i32 : i32
    %1 = arith.addi %0, %arg1 : i32
    %c0_i32 = arith.constant 0 : i32
    %2 = arith.minsi %1, %c0_i32 : i32
    %c0_i32_0 = arith.constant 0 : i32
    %c0_i32_1 = arith.constant 0 : i32
    return %2, %c0_i32_0 : i32, i32
  }
  func.func @transform_2(%arg0: i32, %arg1: i32) -> (i32, i32, i32, i32) {
    %c0_i32 = arith.constant 0 : i32
    %c0_i32_0 = arith.constant 0 : i32
    %c0_i32_1 = arith.constant 0 : i32
    %c0_i32_2 = arith.constant 0 : i32
    return %arg0, %c0_i32, %c0_i32_0, %c0_i32_1 : i32, i32, i32, i32
  }
}

</mosaic_0001>

<bundles_post_ra>
// kernel: tpu_custom_call.1
= control target key start
LH: loop header
LB: loop body
LE: loop exit
PB: predicated region body
PF: predicated region fallthrough
CT: control target
= control target key end

     0   :  { %7 = vsyncpa [#allocation3], 0  ;;  %s288_s0 = inlined_call_operand.hbm [shape: f32[16,128], index: 0, kind: input, shape index: {}]   ;;  %s289_s1 = inlined_call_operand.hbm [shape: f32[16,128], index: 1, kind: input, shape index: {}]   ;;  %s290_s2 = inlined_call_operand.hbm [shape: f32[1,3,1,128], index: 2, kind: output, shape index: {}]  }
   0x1   :  { %8 = vsyncpa [#allocation6], 0 }
   0x2   :  { %9 = vsyncpa [#allocation4], 0  ;;  %s229_s9 = smov [#allocation2]   ;;  %s157_s13 = scalar_lea.hbm %s288_s0, 256 }
   0x3   :  { %s21_s10 = sshll.u32 %s229_s9, 4  ;;  %p158_p0 = scmp.ne.s32.totalorder %s288_s0, %s157_s13  ;;  %s22_s10 = int_to_ptr.vmem [resolvable:$true] %s21_s10 }
   0x4   :  { %p161_p1 = scmp.lt.u32.totalorder %s157_s13, %s288_s0 }
   0x6   :  { %p163_p2 = pnand %p161_p1, %p158_p0 }
   0x8   :  { %166 = shalt.err (!%p163_p2)
}
   0x9   :  { %s167_s18 = scalar_lea.vmem %s22_s10, 256  ;;  %p172_p4 = scmp.lt.s32.totalorder %s22_s10, %s22_s10 }
   0xa   :  { %p168_p3 = scmp.ne.s32.totalorder %s22_s10, %s167_s18  ;;  %p173_p5 = scmp.lt.s32.totalorder %s167_s18, %s167_s18 }
   0xc   :  { %p174_p6 = por %p173_p5, %p172_p4 }
   0xe   :  { %p175_p7 = pnand %p174_p6, %p168_p3 }
  0x10   :  { %178 = shalt.err (!%p175_p7)
}
  0x11   :  { %s230_s19 = smov 128   ;;  %s231_s20 = smov 8  }
  0x12   :  { %27 = dma.hbm_to_vmem [thread:$0]  %s288_s0, 256, %s22_s10, [#allocation3], %s230_s19, %s230_s19, %s231_s20  }
  0x13   :  { %s232_s23 = smov [#allocation5]   ;;  %s179_s27 = scalar_lea.hbm %s289_s1, 256 }
  0x14   :  { %s39_s24 = sshll.u32 %s232_s23, 4  ;;  %p180_p8 = scmp.ne.s32.totalorder %s289_s1, %s179_s27  ;;  %s40_s24 = int_to_ptr.vmem [resolvable:$true] %s39_s24 }
  0x15   :  { %p183_p9 = scmp.lt.u32.totalorder %s179_s27, %s289_s1 }
  0x17   :  { %p185_p10 = pnand %p183_p9, %p180_p8 }
  0x19   :  { %188 = shalt.err (!%p185_p10)
}
  0x1a   :  { %s189_s4 = scalar_lea.vmem %s40_s24, 256  ;;  %p194_p12 = scmp.lt.s32.totalorder %s40_s24, %s40_s24 }
  0x1b   :  { %p190_p11 = scmp.ne.s32.totalorder %s40_s24, %s189_s4  ;;  %p195_p13 = scmp.lt.s32.totalorder %s189_s4, %s189_s4 }
  0x1d   :  { %p196_p0 = por %p195_p13, %p194_p12 }
  0x1f   :  { %p197_p1 = pnand %p196_p0, %p190_p11 }
  0x21   :  { %200 = shalt.err (!%p197_p1)
}
  0x22   :  { %45 = dma.hbm_to_vmem [thread:$0]  %s289_s1, 256, %s40_s24, [#allocation6], %s230_s19, %s230_s19, %s231_s20  }
  0x23   :  { %223 = dma.done.wait [#allocation3], 256  }
  0x24   :  { %224 = vsyncadd [#allocation3], 4294967040 }
  0x25   :  { %225 = dma.done.wait [#allocation6], 256  }
  0x26   :  { %226 = vsyncadd [#allocation6], 4294967040  ;;  %v233_v0 = vmov 0.0   ;;  %v67_v1 = vld [vmem:[#allocation2] sm:$0xff]  ;;  %v68_v2 = vld [vmem:[#allocation2 + $0x8] sm:$0xff]  ;;  %s234_s1 = smov [#allocation7]  }
  0x27   :  { %64 = vst [vmem:[#allocation7] sm:$0x1] %v233_v0  ;;  %65 = vst [vmem:[#allocation7 + $0x1] sm:$0x1] %v233_v0  ;;  %v69_v3 = vld [vmem:[#allocation5] sm:$0xff]  ;;  %v70_v4 = vld [vmem:[#allocation5 + $0x8] sm:$0xff] }
  0x28   :  { %66 = vst [vmem:[#allocation7 + $0x2] sm:$0x1] %v233_v0  ;;  %v139_v5 = vmul.f32 -1.442695, %v67_v1  ;;  %v140_v6 = vmul.f32 -1.442695, %v68_v2  ;;  %v108_v7 = vadd.f32 %v70_v4, %v69_v3 }
  0x29   :  { %s122_s6 = sshll.u32 %s234_s1, 4  ;;  %s123_s6 = int_to_ptr.vmem [resolvable:$true] %s122_s6 }
  0x2a   :  { %149 = vpow2.f32 %v139_v5  ;;  %v109_v8 = vrot.slane %v108_v7, 4  ;;  %s201_s7 = scalar_lea.vmem %s123_s6, 48  ;;  %s205_s8 = scalar_lea.vmem %s123_s6, 64 }
  0x2b   :  { %151 = vpow2.f32 %v140_v6  ;;  %p202_p2 = scmp.ne.s32.totalorder %s123_s6, %s201_s7  ;;  %p206_p3 = scmp.lt.s32.totalorder %s123_s6, %s123_s6 }
  0x2c   :  { %v110_v9 = vadd.f32 %v109_v8, %v108_v7  ;;  %p207_p4 = scmp.lt.s32.totalorder %s205_s8, %s201_s7 }
  0x2e   :  { %v111_v10 = vrot.slane %v110_v9, 2  ;;  %v96_v35 = vld [vmem:[#allocation7 + $0x1] sm:$0x1]  ;;  %v83_v38 = vld [vmem:[#allocation7] sm:$0x1]  ;;  %p208_p5 = por %p207_p4, %p206_p3 }
  0x2f   :  { %v107_v14 = vld [vmem:[#allocation7 + $0x2] sm:$0x1] }
  0x30   :  { %v112_v11 = vadd.f32 %v111_v10, %v110_v9  ;;  %p209_p6 = pnand %p208_p5, %p202_p2 }
  0x32   :  { %v113_v12 = vrot.slane %v112_v11, 1 }
  0x34   :  { %v150_v13 = vpop.eup %149  ;;  %v114_v17 = vadd.f32 %v113_v12, %v112_v11 }
  0x35   :  { %v152_v15 = vpop.eup %151  ;;  %v77_v16 = vadd.f32 1.0, %v150_v13 }
  0x36   :  { %v78_v18 = vadd.f32 1.0, %v152_v15  ;;  %v115_v19 = vadd.f32 %v114_v17, %v107_v14 }
  0x37   :  { %153 = vrcp.f32 %v77_v16 }
  0x38   :  { %155 = vrcp.f32 %v78_v18  ;;  %116 = vst [vmem:[#allocation7 + $0x2] sm:$0x1] %v115_v19 }
  0x41   :  { %v154_v20 = vpop.eup %153 }
  0x42   :  { %v156_v21 = vpop.eup %155  ;;  %v84_v22 = vmul.f32 %v154_v20, %v69_v3 }
  0x43   :  { %v85_v23 = vmul.f32 %v156_v21, %v70_v4  ;;  %v97_v24 = vadd.f32 %v156_v21, %v154_v20 }
  0x45   :  { %v86_v25 = vadd.f32 %v85_v23, %v84_v22  ;;  %v98_v26 = vrot.slane %v97_v24, 4 }
  0x47   :  { %v87_v27 = vrot.slane %v86_v25, 4  ;;  %v99_v28 = vadd.f32 %v98_v26, %v97_v24 }
  0x49   :  { %v88_v29 = vadd.f32 %v87_v27, %v86_v25  ;;  %v100_v30 = vrot.slane %v99_v28, 2 }
  0x4b   :  { %v89_v31 = vrot.slane %v88_v29, 2  ;;  %v101_v32 = vadd.f32 %v100_v30, %v99_v28 }
  0x4d   :  { %v90_v33 = vadd.f32 %v89_v31, %v88_v29  ;;  %v102_v34 = vrot.slane %v101_v32, 1 }
  0x4f   :  { %v91_v36 = vrot.slane %v90_v33, 1  ;;  %v103_v37 = vadd.f32 %v102_v34, %v101_v32 }
  0x51   :  { %v92_v39 = vadd.f32 %v91_v36, %v90_v33  ;;  %v104_v40 = vadd.f32 %v103_v37, %v96_v35 }
  0x53   :  { %v93_v41 = vadd.f32 %v92_v39, %v83_v38  ;;  %105 = vst [vmem:[#allocation7 + $0x1] sm:$0x1] %v104_v40 }
  0x55   :  { %94 = vst [vmem:[#allocation7] sm:$0x1] %v93_v41 }
  0x56   :  { %212 = shalt.err (!%p209_p6)
}
  0x57   :  { %s213_s11 = scalar_lea.hbm %s290_s2, 48 }
  0x58   :  { %p214_p7 = scmp.ne.s32.totalorder %s290_s2, %s213_s11  ;;  %p217_p8 = scmp.lt.u32.totalorder %s213_s11, %s290_s2 }
  0x5a   :  { %p219_p9 = pnand %p217_p8, %p214_p7 }
  0x5c   :  { %222 = shalt.err (!%p219_p9)
}
  0x5d   :  { %s235_s16 = smov 16   ;;  %s236_s17 = smov 1  }
  0x5e   :  { %128 = dma.vmem_to_hbm [thread:$0]  %s123_s6, 48, %s290_s2, [#allocation4], %s235_s16, %s235_s16, %s236_s17  }
  0x5f   :  { %227 = dma.done.wait [#allocation4], 48  }
  0x60   :  { %228 = vsyncadd [#allocation4], 4294967248 }
  0x61   :  { %132 = vsyncpa [#allocation3], 1 }
  0x62   :  { %133 = vsyncpa [#allocation6], 1 }
  0x63   :  { %134 = vsyncpa [#allocation4], 1 }

</bundles_post_ra>
